<compile_context>
chip_gen: v7x
topology: tpu7x:2x2x1
jax: 0.10.0
libtpu: 0.0.40
codegen_flags: <defaults>
</compile_context>

<pallas_src>
import functools
import math

import jax
import jax.numpy as jnp
from jax.experimental import pallas as pl
from jax.experimental.pallas import tpu as pltpu


def make_positional_encoding(d_model: int, num_positions: int,
                             dtype=jnp.float32) -> jnp.ndarray:
    """Build the `pe` buffer exactly as PositionalEncoding.__init__ does.

    Stored directly in the activation dtype so forward() never re-casts it.
    (The PyTorch `div_term[:max_len]` slice is a no-op for every supported
    configuration, so it is dropped.)
    """
    max_len = num_positions
    position = jnp.arange(0, max_len, dtype=jnp.float32)[:, None]            # (max_len, 1)
    div_term = jnp.exp(
        jnp.arange(0, d_model, 2, dtype=jnp.float32) * -(math.log(10000.0) / d_model)
    )                                                                         # (d_model//2,)
    pe = jnp.zeros((max_len, 1, d_model), dtype=jnp.float32)
    pe = pe.at[:, 0, 0::2].set(jnp.sin(position * div_term))
    pe = pe.at[:, 0, 1::2].set(jnp.cos(position * div_term))
    return pe.astype(dtype)


def _vmem_capacity_bytes() -> int:
    try:
        return int(pltpu.get_tpu_info().vmem_capacity_bytes)
    except Exception:
        return 64 << 20  # conservative (v7x-sized) fallback


def _add_pe_kernel_3d(x_ref, pe_ref, o_ref):
    # x_ref: (tS, B, D); pe_ref: (tS, 1, D) -> broadcasts over batch on the VPU.
    o_ref[...] = x_ref[...] + pe_ref[...]


def _add_pe_kernel_flat(x_ref, pe_ref, o_ref, *, batch):
    # x_ref/o_ref: (tS, B*D) lane-dense; pe_ref: (tS, D).
    # Tile pe across the batch on-chip (no pre-broadcast HBM traffic).
    o_ref[...] = x_ref[...] + jnp.tile(pe_ref[...], (1, batch))


def positional_encoding_forward(x: jnp.ndarray, pe: jnp.ndarray) -> jnp.ndarray:
    """x: (S, B, D); pe: (max_len, 1, D).  Returns x + pe[:S] in x.dtype."""
    S, B, D = x.shape
    max_len = pe.shape[0]
    assert S <= max_len, f"sequence length {S} exceeds num_positions {max_len}"
    assert pe.shape[2] == D, "d_model mismatch between x and pe"

    # pe should already live in the activation dtype (see make_positional_encoding);
    # this fallback cast is a no-op in the intended usage.
    if pe.dtype != x.dtype:
        pe = pe.astype(x.dtype)

    itemsize = jnp.dtype(x.dtype).itemsize
    vmem_cap = _vmem_capacity_bytes()
    # ~8 MiB x-blocks on 128-MiB-VMEM chips (v5e/v6e), ~4 MiB on v7x (64 MiB).
    target_block_bytes = (8 << 20) if vmem_cap >= (100 << 20) else (4 << 20)

    cost = pl.CostEstimate(
        flops=S * B * D,
        transcendentals=0,
        bytes_accessed=2 * S * B * D * itemsize + S * D * itemsize,
    )

    lane_dense = (D % 128 == 0) and (B % 8 == 0)

    if lane_dense:
        # ------- 3-D path: trailing (B, D) at full extent, already aligned ----
        row_bytes = B * D * itemsize
        tS = max(1, min(S, target_block_bytes // row_bytes))  # no multiple-of-8 floor
        if S >= 2:
            tS = min(tS, pl.cdiv(S, 2))  # keep >= 2 blocks for v7x's two TCs
        grid = (pl.cdiv(S, tS),)

        x_block_vmem = tS * B * D * itemsize
        pe_block_vmem = tS * 8 * D * itemsize  # middle dim 1 pads to 8 sublanes
        vmem_bytes = 2 * (2 * x_block_vmem + pe_block_vmem) + (4 << 20)
        vmem_bytes = int(max(16 << 20, min(vmem_bytes, vmem_cap - (8 << 20))))

        return pl.pallas_call(
            _add_pe_kernel_3d,
            out_shape=jax.ShapeDtypeStruct((S, B, D), x.dtype),
            grid=grid,
            in_specs=[
                pl.BlockSpec((tS, B, D), lambda i: (i, 0, 0)),   # x: tiled over S
                pl.BlockSpec((tS, 1, D), lambda i: (i, 0, 0)),   # pe: S-indexed only
            ],
            out_specs=pl.BlockSpec((tS, B, D), lambda i: (i, 0, 0)),
            compiler_params=pltpu.CompilerParams(
                dimension_semantics=("parallel",),
                vmem_limit_bytes=vmem_bytes,
            ),
            cost_estimate=cost,
        )(x, pe)

    # ------- flat path: (S, B*D) output keeps the store lane-dense ------------
    bd = B * D
    lanes = pl.cdiv(bd, 128) * 128
    row_bytes = lanes * itemsize

    tS_cap = max(1, target_block_bytes // row_bytes)
    if tS_cap >= S:
        tS = S                                    # full extent: always legal
    else:
        tS = min(S, max(8, (tS_cap // 8) * 8))    # partial S blocks need tS % 8 == 0
    if S >= 16:
        # keep >= 2 blocks on the parallel S axis for v7x's two TensorCores
        tS = min(tS, max(8, (pl.cdiv(S, 2) // 8) * 8))
    grid = (pl.cdiv(S, tS),)

    sub = pl.cdiv(tS, 8) * 8
    x_block_vmem = sub * lanes * itemsize
    pe_block_vmem = sub * (pl.cdiv(D, 128) * 128) * itemsize
    # + one x-block of headroom for the on-chip tiled pe temporary.
    vmem_bytes = 2 * (2 * x_block_vmem + pe_block_vmem) + x_block_vmem + (4 << 20)
    vmem_bytes = int(max(16 << 20, min(vmem_bytes, vmem_cap - (8 << 20))))

    x_flat = x.reshape(S, bd)             # contiguous -> bitcast, no copy
    pe_flat = pe.reshape(max_len, D)      # squeeze broadcast axis, no copy

    out_flat = pl.pallas_call(
        functools.partial(_add_pe_kernel_flat, batch=B),
        out_shape=jax.ShapeDtypeStruct((S, bd), x.dtype),
        grid=grid,
        in_specs=[
            pl.BlockSpec((tS, bd), lambda i: (i, 0)),    # x: tiled over S, lane-dense
            pl.BlockSpec((tS, D), lambda i: (i, 0)),     # pe: S-indexed only
        ],
        out_specs=pl.BlockSpec((tS, bd), lambda i: (i, 0)),
        compiler_params=pltpu.CompilerParams(
            dimension_semantics=("parallel",),
            vmem_limit_bytes=vmem_bytes,
        ),
        cost_estimate=cost,
    )(x_flat, pe_flat)
    return out_flat.reshape(S, B, D)


if __name__ == "__main__":
    key = jax.random.PRNGKey(0)
    k1, k2 = jax.random.split(key)

    # Test 1: module-sized shapes (exercises the flat / lane-densified path).
    d_model, num_positions, seq, batch = 32, 16, 8, 2
    pe = make_positional_encoding(d_model, num_positions, dtype=jnp.float32)
    x = jax.random.normal(k1, (seq, batch, d_model), dtype=jnp.float32)
    ref = x + pe[:seq]
    out = jax.block_until_ready(positional_encoding_forward(x, pe))
    assert out.shape == x.shape and out.dtype == x.dtype
    assert jnp.allclose(out, ref, atol=1e-6), "mismatch vs reference (flat path)"

    # Test 2: aligned shapes (exercises the 3-D lane-dense path, grid >= 2).
    d_model2, num_positions2, seq2, batch2 = 128, 32, 16, 8
    pe2 = make_positional_encoding(d_model2, num_positions2, dtype=jnp.float32)
    x2 = jax.random.normal(k2, (seq2, batch2, d_model2), dtype=jnp.float32)
    ref2 = x2 + pe2[:seq2]
    out2 = jax.block_until_ready(positional_encoding_forward(x2, pe2))
    assert out2.shape == x2.shape and out2.dtype == x2.dtype
    assert jnp.allclose(out2, ref2, atol=1e-6), "mismatch vs reference (3-D path)"

    print("KERNEL_OK")
</pallas_src>

<mosaic_0001>
module attributes {stable_mosaic.version = 11 : i64} {
  func.func @_add_pe_kernel_flat(%arg0: i32, %arg1: memref<8x64xf32, #tpu.memory_space<vmem>>, %arg2: memref<8x32xf32, #tpu.memory_space<vmem>>, %arg3: memref<8x64xf32, #tpu.memory_space<vmem>>) attributes {dimension_semantics = [#tpu.dimension_semantics<parallel>], iteration_bounds = array<i64: 1>, scalar_prefetch = 0 : i64, scratch_operands = 0 : i64, tpu.core_type = #tpu.core_type<tc>, window_params = [{transform_indices = @transform_0, window_bounds = array<i64: 8, 64>}, {transform_indices = @transform_1, window_bounds = array<i64: 8, 32>}, {transform_indices = @transform_2, window_bounds = array<i64: 8, 64>}]} {
    %c0 = arith.constant 0 : index
    %c0_0 = arith.constant 0 : index
    %0 = vector.load %arg1[%c0, %c0_0] : memref<8x64xf32, #tpu.memory_space<vmem>>, vector<8x64xf32>
    %c0_1 = arith.constant 0 : index
    %c0_2 = arith.constant 0 : index
    %1 = vector.load %arg2[%c0_1, %c0_2] : memref<8x32xf32, #tpu.memory_space<vmem>>, vector<8x32xf32>
    %2 = tpu.concatenate %1, %1 in 1 : vector<8x32xf32>, vector<8x32xf32> -> vector<8x64xf32>
    %3 = arith.addf %0, %2 : vector<8x64xf32>
    %c0_3 = arith.constant 0 : index
    %c0_4 = arith.constant 0 : index
    %4 = vector.load %arg3[%c0_3, %c0_4] : memref<8x64xf32, #tpu.memory_space<vmem>>, vector<8x64xf32>
    tpu.vector_store %arg3[%c0_3, %c0_4], %3 {strides = array<i32>} : memref<8x64xf32, #tpu.memory_space<vmem>>, vector<8x64xf32>,
    return
  }
  func.func @transform_0(%arg0: i32) -> (i32, i32) {
    %c0_i32 = arith.constant 0 : i32
    %c0_i32_0 = arith.constant 0 : i32
    return %arg0, %c0_i32 : i32, i32
  }
  func.func @transform_1(%arg0: i32) -> (i32, i32) {
    %c0_i32 = arith.constant 0 : i32
    %c0_i32_0 = arith.constant 0 : i32
    return %arg0, %c0_i32 : i32, i32
  }
  func.func @transform_2(%arg0: i32) -> (i32, i32) {
    %c0_i32 = arith.constant 0 : i32
    %c0_i32_0 = arith.constant 0 : i32
    return %arg0, %c0_i32 : i32, i32
  }
}

</mosaic_0001>

<bundles_post_ra>
// kernel: tpu_custom_call.1
= control target key start
LH: loop header
LB: loop body
LE: loop exit
PB: predicated region body
PF: predicated region fallthrough
CT: control target
= control target key end

     0   :  { %7 = vsyncpa [#allocation3], 0  ;;  %s204_s0 = inlined_call_operand.hbm [shape: f32[8,64], index: 0, kind: input, shape index: {}]   ;;  %s205_s1 = inlined_call_operand.hbm [shape: f32[16,32], index: 1, kind: input, shape index: {}]   ;;  %s206_s2 = inlined_call_operand.hbm [shape: f32[8,64], index: 2, kind: output, shape index: {}]  }
   0x1   :  { %8 = vsyncpa [#allocation6], 0 }
   0x2   :  { %9 = vsyncpa [#allocation4], 0  ;;  %s139_s9 = smov [#allocation2]   ;;  %s140_s11 = smov [#allocation5]  }
   0x3   :  { %s16_s10 = sshll.u32 %s139_s9, 4  ;;  %s26_s12 = sshll.u32 %s140_s11, 4  ;;  %s17_s10 = int_to_ptr.vmem [resolvable:$true] %s16_s10  ;;  %s158_s12 = int_to_ptr.vmem [resolvable:$true] %s26_s12 }
   0x4   :  { %s67_s15 = scalar_lea.hbm %s204_s0, 128 }
   0x5   :  { %p68_p0 = scmp.ne.s32.totalorder %s204_s0, %s67_s15  ;;  %p71_p1 = scmp.lt.u32.totalorder %s67_s15, %s204_s0 }
   0x7   :  { %p73_p2 = pnand %p71_p1, %p68_p0 }
   0x9   :  { %76 = shalt.err (!%p73_p2)
}
   0xa   :  { %s77_s20 = scalar_lea.vmem %s17_s10, 128  ;;  %p82_p4 = scmp.lt.s32.totalorder %s17_s10, %s17_s10 }
   0xb   :  { %p78_p3 = scmp.ne.s32.totalorder %s17_s10, %s77_s20  ;;  %p83_p5 = scmp.lt.s32.totalorder %s77_s20, %s77_s20 }
   0xd   :  { %p84_p6 = por %p83_p5, %p82_p4 }
   0xf   :  { %p85_p7 = pnand %p84_p6, %p78_p3 }
  0x11   :  { %88 = shalt.err (!%p85_p7)
}
  0x12   :  { %19 = dma.hbm_to_vmem [thread:$0]  %s204_s0, 128, %s17_s10, [#allocation3]  }
  0x13   :  { %s89_s25 = scalar_lea.hbm %s205_s1, 128  ;;  %s91_s30 = scalar_lea.hbm %s205_s1, 256 }
  0x14   :  { %p90_p8 = scmp.ne.s32.totalorder %s205_s1, %s89_s25  ;;  %p92_p9 = scmp.lt.u32.totalorder %s91_s30, %s89_s25 }
  0x15   :  { %p93_p10 = scmp.lt.u32.totalorder %s89_s25, %s205_s1 }
  0x17   :  { %p94_p11 = por %p93_p10, %p92_p9 }
  0x19   :  { %p95_p12 = pnand %p94_p11, %p90_p8 }
  0x1b   :  { %98 = shalt.err (!%p95_p12)
}
  0x1c   :  { %s99_s0 = scalar_lea.vmem %s158_s12, 128  ;;  %p104_p0 = scmp.lt.s32.totalorder %s158_s12, %s158_s12 }
  0x1d   :  { %p100_p13 = scmp.ne.s32.totalorder %s158_s12, %s99_s0  ;;  %p105_p1 = scmp.lt.s32.totalorder %s99_s0, %s99_s0 }
  0x1f   :  { %p106_p2 = por %p105_p1, %p104_p0 }
  0x21   :  { %p107_p3 = pnand %p106_p2, %p100_p13 }
  0x23   :  { %110 = shalt.err (!%p107_p3)
}
  0x24   :  { %29 = dma.hbm_to_vmem [thread:$0]  %s205_s1, 128, %s158_s12, [#allocation6]  }
  0x25   :  { %133 = dma.done.wait [#allocation3], 128  }
  0x26   :  { %134 = vsyncadd [#allocation3], 4294967168 }
  0x27   :  { %135 = dma.done.wait [#allocation6], 128  }
  0x28   :  { %136 = vsyncadd [#allocation6], 4294967168  ;;  %v37_v0 = vld [vmem:[#allocation5] sm:$0xff]  ;;  %s141_s7 = smov 32   ;;  %vm42_vm0 = vcmask 261120   ;;  %v36_v1 = vld [vmem:[#allocation2] sm:$0xff] }
  0x29   :  { %39 = vrot.lane.b32.xlu0 %v37_v0, %s141_s7  ;;  %s142_s8 = smov [#allocation7]   ;;  %vm45_vm1 = vcmask 523264  }
  0x2a   :  { %s53_s9 = sshll.u32 %s142_s8, 4  ;;  %s54_s9 = int_to_ptr.vmem [resolvable:$true] %s53_s9 }
  0x2b   :  { %s111_s10 = scalar_lea.vmem %s54_s9, 128  ;;  %p116_p5 = scmp.lt.s32.totalorder %s54_s9, %s54_s9 }
  0x2c   :  { %p112_p4 = scmp.ne.s32.totalorder %s54_s9, %s111_s10  ;;  %p117_p6 = scmp.lt.s32.totalorder %s111_s10, %s111_s10 }
  0x2e   :  { %p118_p7 = por %p117_p6, %p116_p5 }
  0x30   :  { %p119_p8 = pnand %p118_p7, %p112_p4 }
  0x9b   :  { %v40_v2 = vpop.permute.xlu0 %39 }
  0x9c   :  { %v43_v3 = vsel %vm42_vm0, %v37_v0, %v40_v2 }
  0x9d   :  { %v44_v4 = vadd.f32 %v43_v3, %v36_v1 }
  0x9f   :  { %46 = vst.msk [vmem:[#allocation7] sm:$0xff] %vm45_vm1, %v44_v4 }
  0xa0   :  { %122 = shalt.err (!%p119_p8)
}
  0xa1   :  { %s123_s12 = scalar_lea.hbm %s206_s2, 128 }
  0xa2   :  { %p124_p9 = scmp.ne.s32.totalorder %s206_s2, %s123_s12  ;;  %p127_p10 = scmp.lt.u32.totalorder %s123_s12, %s206_s2 }
  0xa4   :  { %p129_p11 = pnand %p127_p10, %p124_p9 }
  0xa6   :  { %132 = shalt.err (!%p129_p11)
}
  0xa7   :  { %56 = dma.vmem_to_hbm [thread:$0]  %s54_s9, 128, %s206_s2, [#allocation4]  }
  0xa8   :  { %137 = dma.done.wait [#allocation4], 128  }
  0xa9   :  { %138 = vsyncadd [#allocation4], 4294967168 }
  0xaa   :  { %60 = vsyncpa [#allocation3], 1 }
  0xab   :  { %61 = vsyncpa [#allocation6], 1 }
  0xac   :  { %62 = vsyncpa [#allocation4], 1 }

</bundles_post_ra>
